<compile_context>
chip_gen: v7x
topology: tpu7x:2x2x1
jax: 0.10.0
libtpu: 0.0.40
codegen_flags: <defaults>
</compile_context>

<pallas_src>
import jax
import jax.numpy as jnp
from jax.experimental import pallas as pl
from jax.experimental.pallas import tpu as pltpu


def _round_up(x, m):
    return ((x + m - 1) // m) * m


# ----------------------------------------------------------------------------- #
# Fused kernel: (tm, Cin) @ (Cin, 2*Cout) + bias, then split into mu / scale.
# Note: the in-kernel lane split acc[:, :cout] is free only when cout is a
# multiple of 128 (it is for the module defaults: 128); other values are still
# correct but incur cross-lane shuffles / masked stores.
# ----------------------------------------------------------------------------- #
def _vdraw_kernel(x_ref, w_ref, b_ref, mu_ref, scale_ref):
    # Single MXU pass for both linear layers (weights concatenated on N).
    acc = jnp.dot(x_ref[...], w_ref[...], preferred_element_type=jnp.float32)
    acc = acc + b_ref[...].astype(jnp.float32)      # broadcast (1, 2*Cout) bias (VPU)
    cout = mu_ref.shape[-1]
    mu_ref[...] = acc[:, :cout].astype(mu_ref.dtype)
    # 0.5 already folded into the logvar weights/bias -> bare exp on the EUP.
    scale_ref[...] = jnp.exp(acc[:, cout:]).astype(scale_ref.dtype)


# ----------------------------------------------------------------------------- #
# One-time parameter fusion: PyTorch-layout (Cout, Cin) weights ->
# lane-dense (Cin, 2*Cout) weight + (1, 2*Cout) bias, with 0.5 folded into the
# logvar half so the kernel computes exp(.) directly.
# ----------------------------------------------------------------------------- #
def fuse_vdraw_params(params, dtype=None):
    w_mu, b_mu, w_lv, b_lv = params
    dtype = dtype if dtype is not None else w_mu.dtype
    w_cat = jnp.concatenate([w_mu.T, 0.5 * w_lv.T], axis=1).astype(dtype)   # (Cin, 2*Cout)
    b_cat = jnp.concatenate([b_mu, 0.5 * b_lv]).reshape(1, -1).astype(dtype)  # (1, 2*Cout)
    return w_cat, b_cat


def vdraw_forward(x, fused_params, *, tm=1024):
    """x: (..., Cin).  fused_params from fuse_vdraw_params.  Returns (loc, scale)."""
    w_cat, b_cat = fused_params
    orig_shape = x.shape
    cin = orig_shape[-1]
    two_cout = w_cat.shape[1]
    cout = two_cout // 2
    dt = x.dtype

    # Flatten all leading dims into one big row axis M (reshape only; no copy/pad).
    x2 = x.reshape(-1, cin)
    m = x2.shape[0]

    # Row tile: as large as useful, but capped so the grid has >= 2 steps when M
    # permits (v7x megacore sharding on the "parallel" axis).
    half = -(-m // 2)
    tm_eff = max(8, min(tm, _round_up(half, 8)))
    grid = (pl.cdiv(m, tm_eff),)        # partial last tile handled by Pallas masking

    # Modest, footprint-derived VMEM budget (double-buffered tiles + resident weights).
    itemsize = jnp.dtype(dt).itemsize
    tile_bytes = tm_eff * (cin + two_cout) * itemsize          # input tile + both output tiles
    resident_bytes = (cin + 1) * two_cout * itemsize           # fused weights + bias
    vmem_budget = int(min(32 * 1024 * 1024,
                          max(16 * 1024 * 1024, 4 * tile_bytes + 2 * resident_bytes)))

    cost = pl.CostEstimate(
        flops=2 * m * cin * two_cout,
        transcendentals=m * cout,
        bytes_accessed=(m * cin + m * two_cout + (cin + 1) * two_cout) * itemsize,
    )

    mu, scale = pl.pallas_call(
        _vdraw_kernel,
        out_shape=(jax.ShapeDtypeStruct((m, cout), dt),
                   jax.ShapeDtypeStruct((m, cout), dt)),
        grid=grid,
        in_specs=[
            pl.BlockSpec((tm_eff, cin), lambda i: (i, 0)),       # activations (tiled)
            pl.BlockSpec((cin, two_cout), lambda i: (0, 0)),     # fused weights (resident)
            pl.BlockSpec((1, two_cout), lambda i: (0, 0)),       # fused bias (resident)
        ],
        out_specs=(pl.BlockSpec((tm_eff, cout), lambda i: (i, 0)),
                   pl.BlockSpec((tm_eff, cout), lambda i: (i, 0))),
        compiler_params=pltpu.CompilerParams(
            dimension_semantics=("parallel",),      # megacore sharding on v7x
            vmem_limit_bytes=vmem_budget,
        ),
        cost_estimate=cost,
    )(x2, w_cat, b_cat)

    out_shape = orig_shape[:-1] + (cout,)
    return mu.reshape(out_shape), scale.reshape(out_shape)


# Pure-JAX reference (for correctness check).
def vdraw_forward_ref(x, params):
    w_mu, b_mu, w_lv, b_lv = params
    mu = jnp.dot(x, w_mu.T) + b_mu
    logvar = jnp.dot(x, w_lv.T) + b_lv
    return mu, jnp.exp(0.5 * logvar)


# Plain-JAX reparametrization helper (module's .reparametrization()); the RNG
# draw itself is not part of the fused kernel.
def reparametrize(loc, scale, key, training=True):
    if training:
        return loc + scale * jax.random.normal(key, loc.shape, loc.dtype)
    return loc


# ----------------------------------------------------------------------------- #
# Deterministic PyTorch-style Linear init (uniform +- 1/sqrt(in_features)).
# ----------------------------------------------------------------------------- #
def init_params(key, in_channels, out_channels, dtype=jnp.float32):
    k1, k2, k3, k4 = jax.random.split(key, 4)
    bound = 1.0 / (in_channels ** 0.5)
    w_mu = jax.random.uniform(k1, (out_channels, in_channels), dtype, -bound, bound)
    b_mu = jax.random.uniform(k2, (out_channels,), dtype, -bound, bound)
    w_lv = jax.random.uniform(k3, (out_channels, in_channels), dtype, -bound, bound)
    b_lv = jax.random.uniform(k4, (out_channels,), dtype, -bound, bound)
    return w_mu, b_mu, w_lv, b_lv


if __name__ == "__main__":
    key = jax.random.PRNGKey(0)
    kx, kp = jax.random.split(key)

    # Module defaults: in_channels=256, out_channels=128; small batch.
    batch, in_channels, out_channels = 8, 256, 128
    x = jax.random.normal(kx, (batch, in_channels), jnp.float32)
    params = init_params(kp, in_channels, out_channels)

    # One-time weight fusion (0.5 folded into the logvar half).
    fused = fuse_vdraw_params(params)

    loc, scale = jax.block_until_ready(vdraw_forward(x, fused))

    # Correctness vs pure-JAX reference.
    loc_ref, scale_ref = vdraw_forward_ref(x, params)
    assert loc.shape == (batch, out_channels), loc.shape
    assert scale.shape == (batch, out_channels), scale.shape
    assert jnp.allclose(loc, loc_ref, atol=1e-4, rtol=1e-4), \
        float(jnp.max(jnp.abs(loc - loc_ref)))
    assert jnp.allclose(scale, scale_ref, atol=1e-4, rtol=1e-4), \
        float(jnp.max(jnp.abs(scale - scale_ref)))
    assert bool(jnp.all(scale > 0))

    print("KERNEL_OK")
</pallas_src>

<mosaic_0001>
module attributes {stable_mosaic.version = 11 : i64} {
  func.func @_vdraw_kernel(%arg0: i32, %arg1: memref<8x256xf32, #tpu.memory_space<vmem>>, %arg2: memref<256x256xf32, #tpu.memory_space<vmem>>, %arg3: memref<1x256xf32, #tpu.memory_space<vmem>>, %arg4: memref<8x128xf32, #tpu.memory_space<vmem>>, %arg5: memref<8x128xf32, #tpu.memory_space<vmem>>) attributes {dimension_semantics = [#tpu.dimension_semantics<parallel>], iteration_bounds = array<i64: 1>, scalar_prefetch = 0 : i64, scratch_operands = 0 : i64, tpu.core_type = #tpu.core_type<tc>, window_params = [{transform_indices = @transform_0, window_bounds = array<i64: 8, 256>}, {pipeline_mode = #tpu.pipeline_mode<synchronous>, transform_indices = @transform_1, window_bounds = array<i64: 256, 256>}, {pipeline_mode = #tpu.pipeline_mode<synchronous>, transform_indices = @transform_2, window_bounds = array<i64: 1, 256>}, {transform_indices = @transform_3, window_bounds = array<i64: 8, 128>}, {transform_indices = @transform_4, window_bounds = array<i64: 8, 128>}]} {
    %c0 = arith.constant 0 : index
    %c0_0 = arith.constant 0 : index
    %0 = vector.load %arg1[%c0, %c0_0] : memref<8x256xf32, #tpu.memory_space<vmem>>, vector<8x256xf32>
    %c0_1 = arith.constant 0 : index
    %c0_2 = arith.constant 0 : index
    %1 = vector.load %arg2[%c0_1, %c0_2] : memref<256x256xf32, #tpu.memory_space<vmem>>, vector<256x256xf32>
    %cst = arith.constant dense<0.000000e+00> : vector<8x256xf32>
    %2 = tpu.matmul %0, %1, %cst {dimension_numbers = #tpu.dot_dimension_numbers<[1], [0], [0], [1], [0, 0, 1, 1], [], []>} : vector<8x256xf32>, vector<256x256xf32>, vector<8x256xf32> -> vector<8x256xf32>
    %c0_3 = arith.constant 0 : index
    %c0_4 = arith.constant 0 : index
    %3 = vector.load %arg3[%c0_3, %c0_4] : memref<1x256xf32, #tpu.memory_space<vmem>>, vector<1x256xf32>
    %4 = vector.broadcast %3 : vector<1x256xf32> to vector<8x256xf32>
    %5 = arith.addf %2, %4 : vector<8x256xf32>
    %6 = vector.extract_strided_slice %5 {offsets = [0, 0], sizes = [8, 128], strides = [1, 1]} : vector<8x256xf32> to vector<8x128xf32>
    %c0_5 = arith.constant 0 : index
    %c0_6 = arith.constant 0 : index
    %7 = vector.load %arg4[%c0_5, %c0_6] : memref<8x128xf32, #tpu.memory_space<vmem>>, vector<8x128xf32>
    tpu.vector_store %arg4[%c0_5, %c0_6], %6 {strides = array<i32>} : memref<8x128xf32, #tpu.memory_space<vmem>>, vector<8x128xf32>,
    %8 = vector.extract_strided_slice %5 {offsets = [0, 128], sizes = [8, 128], strides = [1, 1]} : vector<8x256xf32> to vector<8x128xf32>
    %9 = math.exp %8 : vector<8x128xf32>
    %c0_7 = arith.constant 0 : index
    %c0_8 = arith.constant 0 : index
    %10 = vector.load %arg5[%c0_7, %c0_8] : memref<8x128xf32, #tpu.memory_space<vmem>>, vector<8x128xf32>
    tpu.vector_store %arg5[%c0_7, %c0_8], %9 {strides = array<i32>} : memref<8x128xf32, #tpu.memory_space<vmem>>, vector<8x128xf32>,
    return
  }
  func.func @transform_0(%arg0: i32) -> (i32, i32) {
    %c0_i32 = arith.constant 0 : i32
    %c0_i32_0 = arith.constant 0 : i32
    return %arg0, %c0_i32 : i32, i32
  }
  func.func @transform_1(%arg0: i32) -> (i32, i32) {
    %c0_i32 = arith.constant 0 : i32
    %c0_i32_0 = arith.constant 0 : i32
    %c0_i32_1 = arith.constant 0 : i32
    return %c0_i32, %c0_i32_0 : i32, i32
  }
  func.func @transform_2(%arg0: i32) -> (i32, i32) {
    %c0_i32 = arith.constant 0 : i32
    %c0_i32_0 = arith.constant 0 : i32
    %c0_i32_1 = arith.constant 0 : i32
    return %c0_i32, %c0_i32_0 : i32, i32
  }
  func.func @transform_3(%arg0: i32) -> (i32, i32) {
    %c0_i32 = arith.constant 0 : i32
    %c0_i32_0 = arith.constant 0 : i32
    return %arg0, %c0_i32 : i32, i32
  }
  func.func @transform_4(%arg0: i32) -> (i32, i32) {
    %c0_i32 = arith.constant 0 : i32
    %c0_i32_0 = arith.constant 0 : i32
    return %arg0, %c0_i32 : i32, i32
  }
}

</mosaic_0001>

<bundles_post_ra>
// kernel: tpu_custom_call.1
= control target key start
LH: loop header
LB: loop body
LE: loop exit
PB: predicated region body
PF: predicated region fallthrough
CT: control target
= control target key end

     0   :  { %10 = vsyncpa [#allocation3], 0  ;;  %s484_s0 = inlined_call_operand.hbm [shape: f32[8,256], index: 0, kind: input, shape index: {}]   ;;  %s485_s1 = inlined_call_operand.hbm [shape: f32[256,256], index: 1, kind: input, shape index: {}]   ;;  %s486_s2 = inlined_call_operand.vmem [shape: f32[1,256], index: 2, kind: input, shape index: {}]   ;;  %s487_s3 = inlined_call_operand.hbm [shape: f32[8,128], index: 3, kind: output, shape index: {0}]   ;;  %s488_s4 = inlined_call_operand.hbm [shape: f32[8,128], index: 4, kind: output, shape index: {1}]  }
   0x1   :  { %11 = vsyncpa [#allocation6], 0 }
   0x2   :  { %12 = vsyncpa [#allocation4], 0 }
   0x3   :  { %13 = vsyncpa [#allocation9], 0  ;;  %s395_s15 = smov [#allocation2]   ;;  %s396_s17 = smov [#allocation5]  }
   0x4   :  { %s20_s16 = sshll.u32 %s395_s15, 4  ;;  %s29_s18 = sshll.u32 %s396_s17, 4  ;;  %s21_s16 = int_to_ptr.vmem [resolvable:$true] %s20_s16  ;;  %s426_s18 = int_to_ptr.vmem [resolvable:$true] %s29_s18 }
   0x5   :  { %s299_s21 = scalar_lea.hbm %s484_s0, 256 }
   0x6   :  { %p300_p0 = scmp.ne.s32.totalorder %s484_s0, %s299_s21  ;;  %p303_p1 = scmp.lt.u32.totalorder %s299_s21, %s484_s0 }
   0x8   :  { %p305_p2 = pnand %p303_p1, %p300_p0 }
   0xa   :  { %308 = shalt.err (!%p305_p2)
}
   0xb   :  { %s309_s26 = scalar_lea.vmem %s21_s16, 256  ;;  %p314_p4 = scmp.lt.s32.totalorder %s21_s16, %s21_s16 }
   0xc   :  { %p310_p3 = scmp.ne.s32.totalorder %s21_s16, %s309_s26  ;;  %p315_p5 = scmp.lt.s32.totalorder %s309_s26, %s309_s26 }
   0xe   :  { %p316_p6 = por %p315_p5, %p314_p4 }
  0x10   :  { %p317_p7 = pnand %p316_p6, %p310_p3 }
  0x12   :  { %320 = shalt.err (!%p317_p7)
}
  0x13   :  { %23 = dma.hbm_to_vmem [thread:$0]  %s484_s0, 256, %s21_s16, [#allocation3]  }
  0x14   :  { %s321_s5 = scalar_lea.hbm %s485_s1, 8192 }
  0x15   :  { %p322_p8 = scmp.ne.s32.totalorder %s485_s1, %s321_s5  ;;  %p325_p9 = scmp.lt.u32.totalorder %s321_s5, %s485_s1 }
  0x17   :  { %p327_p10 = pnand %p325_p9, %p322_p8 }
  0x19   :  { %330 = shalt.err (!%p327_p10)
}
  0x1a   :  { %s331_s10 = scalar_lea.vmem %s426_s18, 8192  ;;  %p336_p12 = scmp.lt.s32.totalorder %s426_s18, %s426_s18 }
  0x1b   :  { %p332_p11 = scmp.ne.s32.totalorder %s426_s18, %s331_s10  ;;  %p337_p13 = scmp.lt.s32.totalorder %s331_s10, %s331_s10 }
  0x1d   :  { %p338_p0 = por %p337_p13, %p336_p12 }
  0x1f   :  { %p339_p1 = pnand %p338_p0, %p332_p11 }
  0x21   :  { %342 = shalt.err (!%p339_p1)
}
  0x22   :  { %s397_s0 = smov 256   ;;  %s398_s11 = smov 16  }
  0x23   :  { %35 = dma.hbm_to_vmem [thread:$0]  %s485_s1, 8192, %s426_s18, [#allocation6], %s397_s0, %s397_s0, %s398_s11  }
  0x24   :  { %387 = dma.done.wait [#allocation3], 256  }
  0x25   :  { %388 = vsyncadd [#allocation3], 4294967040 }
  0x26   :  { %389 = dma.done.wait [#allocation6], 8192  }
  0x27   :  { %390 = vsyncadd [#allocation6], 4294959104  ;;  %v47_v0 = vld [vmem:[#allocation5 + $0x8] sm:$0xff]  ;;  %v49_v1 = vld [vmem:[#allocation5 + $0x18] sm:$0xff]  ;;  %s399_s15 = smov [#allocation7]  }
  0x28   :  { %v46_v2 = vld [vmem:[#allocation5] sm:$0xff]  ;;  %v227_v3 = vpack.c.bf16 %v49_v1, %v47_v0  ;;  %v48_v4 = vld [vmem:[#allocation5 + $0x10] sm:$0xff]  ;;  %v51_v5 = vld [vmem:[#allocation5 + $0x28] sm:$0xff]  ;;  %s203_s16 = sshll.u32 %s399_s15, 4  ;;  %s204_s16 = int_to_ptr.vmem [resolvable:$true] %s203_s16 }
  0x29   :  { %v53_v6 = vld [vmem:[#allocation5 + $0x38] sm:$0xff]  ;;  %v229_v7 = vpack.c.bf16 %v48_v4, %v46_v2  ;;  %v50_v9 = vld [vmem:[#allocation5 + $0x20] sm:$0xff]  ;;  %v52_v10 = vld [vmem:[#allocation5 + $0x30] sm:$0xff]  ;;  %s343_s17 = scalar_lea.vmem %s204_s16, 128  ;;  %p348_p3 = scmp.lt.s32.totalorder %s204_s16, %s204_s16 }
  0x2a   :  { %v231_v8 = vpack.c.bf16 %v53_v6, %v51_v5  ;;  %v55_v11 = vld [vmem:[#allocation5 + $0x48] sm:$0xff]  ;;  %228 = vmatprep.subr.bf16.mxu0 %v227_v3  ;;  %v57_v12 = vld [vmem:[#allocation5 + $0x58] sm:$0xff]  ;;  %v233_v13 = vpack.c.bf16 %v52_v10, %v50_v9  ;;  %v54_v15 = vld [vmem:[#allocation5 + $0x40] sm:$0xff]  ;;  %p344_p2 = scmp.ne.s32.totalorder %s204_s16, %s343_s17  ;;  %p349_p4 = scmp.lt.s32.totalorder %s343_s17, %s343_s17 }
  0x2b   :  { %230 = vmatpush1.bf16.msra.mxu0 %v229_v7  ;;  %v235_v14 = vpack.c.bf16 %v57_v12, %v55_v11  ;;  %v56_v16 = vld [vmem:[#allocation5 + $0x50] sm:$0xff]  ;;  %v59_v17 = vld [vmem:[#allocation5 + $0x68] sm:$0xff]  ;;  %v61_v18 = vld [vmem:[#allocation5 + $0x78] sm:$0xff] }
  0x2c   :  { %232 = vmatprep.subr.bf16.mxu0 %v231_v8  ;;  %v237_v19 = vpack.c.bf16 %v56_v16, %v54_v15  ;;  %v239_v20 = vpack.c.bf16 %v61_v18, %v59_v17  ;;  %v58_v21 = vld [vmem:[#allocation5 + $0x60] sm:$0xff]  ;;  %v60_v22 = vld [vmem:[#allocation5 + $0x70] sm:$0xff]  ;;  %v63_v23 = vld [vmem:[#allocation5 + $0x88] sm:$0xff]  ;;  %p350_p5 = por %p349_p4, %p348_p3 }
  0x2d   :  { %v65_v24 = vld [vmem:[#allocation5 + $0x98] sm:$0xff]  ;;  %v241_v25 = vpack.c.bf16 %v60_v22, %v58_v21  ;;  %v62_v27 = vld [vmem:[#allocation5 + $0x80] sm:$0xff]  ;;  %v64_v28 = vld [vmem:[#allocation5 + $0x90] sm:$0xff] }
  0x2e   :  { %v243_v26 = vpack.c.bf16 %v65_v24, %v63_v23  ;;  %v67_v29 = vld [vmem:[#allocation5 + $0xa8] sm:$0xff]  ;;  %v69_v30 = vld [vmem:[#allocation5 + $0xb8] sm:$0xff]  ;;  %v245_v31 = vpack.c.bf16 %v64_v28, %v62_v27  ;;  %v66_v33 = vld [vmem:[#allocation5 + $0xa0] sm:$0xff]  ;;  %p351_p6 = pnand %p350_p5, %p344_p2 }
  0x2f   :  { %234 = vmatpush1.bf16.msra.mxu0 %v233_v13  ;;  %v247_v32 = vpack.c.bf16 %v69_v30, %v67_v29  ;;  %v68_v34 = vld [vmem:[#allocation5 + $0xb0] sm:$0xff]  ;;  %v71_v35 = vld [vmem:[#allocation5 + $0xc8] sm:$0xff]  ;;  %v73_v36 = vld [vmem:[#allocation5 + $0xd8] sm:$0xff] }
  0x30   :  { %236 = vmatprep.subr.bf16.mxu0 %v235_v14  ;;  %v249_v37 = vpack.c.bf16 %v68_v34, %v66_v33  ;;  %v251_v38 = vpack.c.bf16 %v73_v36, %v71_v35  ;;  %v70_v39 = vld [vmem:[#allocation5 + $0xc0] sm:$0xff]  ;;  %v72_v40 = vld [vmem:[#allocation5 + $0xd0] sm:$0xff]  ;;  %v45_v41 = vld [vmem:[#allocation2 + $0x8] sm:$0xff]  ;;  %v112_v34 = vlaneseq }
  0x31   :  { %v75_v42 = vld [vmem:[#allocation5 + $0xe8] sm:$0xff]  ;;  %v77_v43 = vld [vmem:[#allocation5 + $0xf8] sm:$0xff]  ;;  %186 = vmatprep.mubr.f32.mxu0 %v45_v41  ;;  %v253_v44 = vpack.c.bf16 %v72_v40, %v70_v39  ;;  %v74_v46 = vld [vmem:[#allocation5 + $0xe0] sm:$0xff] }
  0x32   :  { %v255_v45 = vpack.c.bf16 %v77_v43, %v75_v42  ;;  %v76_v47 = vld [vmem:[#allocation5 + $0xf0] sm:$0xff]  ;;  %v79_v48 = vld [vmem:[#allocation5 + $0x108] sm:$0xff]  ;;  %v81_v49 = vld [vmem:[#allocation5 + $0x118] sm:$0xff]  ;;  %v113_v35 = vshrl.u32 %v112_v34, 7 }
  0x33   :  { %238 = vmatpush1.bf16.msra.mxu0 %v237_v19  ;;  %v257_v50 = vpack.c.bf16 %v76_v47, %v74_v46  ;;  %v259_v51 = vpack.c.bf16 %v81_v49, %v79_v48  ;;  %v78_v52 = vld [vmem:[#allocation5 + $0x100] sm:$0xff]  ;;  %v80_v53 = vld [vmem:[#allocation5 + $0x110] sm:$0xff]  ;;  %v83_v54 = vld [vmem:[#allocation5 + $0x128] sm:$0xff] }
  0x34   :  { %240 = vmatprep.subr.bf16.mxu0 %v239_v20  ;;  %v85_v55 = vld [vmem:[#allocation5 + $0x138] sm:$0xff]  ;;  %v261_v56 = vpack.c.bf16 %v80_v53, %v78_v52  ;;  %v82_v58 = vld [vmem:[#allocation5 + $0x120] sm:$0xff]  ;;  %v84_v59 = vld [vmem:[#allocation5 + $0x130] sm:$0xff]  ;;  %v114_v36 = vsub.s32 0, %v113_v35 }
  0x35   :  { %v263_v57 = vpack.c.bf16 %v85_v55, %v83_v54  ;;  %v87_v60 = vld [vmem:[#allocation5 + $0x148] sm:$0xff]  ;;  %v89_v61 = vld [vmem:[#allocation5 + $0x158] sm:$0xff]  ;;  %v265_v62 = vpack.c.bf16 %v84_v59, %v82_v58  ;;  %v86_v0 = vld [vmem:[#allocation5 + $0x140] sm:$0xff] }
  0x36   :  { %v267_v63 = vpack.c.bf16 %v89_v61, %v87_v60  ;;  %v88_v1 = vld [vmem:[#allocation5 + $0x150] sm:$0xff]  ;;  %v91_v2 = vld [vmem:[#allocation5 + $0x168] sm:$0xff]  ;;  %v93_v3 = vld [vmem:[#allocation5 + $0x178] sm:$0xff] }
  0x37   :  { %242 = vmatpush1.bf16.msra.mxu0 %v241_v25  ;;  %v269_v4 = vpack.c.bf16 %v88_v1, %v86_v0  ;;  %v271_v5 = vpack.c.bf16 %v93_v3, %v91_v2  ;;  %v90_v6 = vld [vmem:[#allocation5 + $0x160] sm:$0xff]  ;;  %v92_v7 = vld [vmem:[#allocation5 + $0x170] sm:$0xff]  ;;  %v95_v8 = vld [vmem:[#allocation5 + $0x188] sm:$0xff] }
  0x38   :  { %244 = vmatprep.subr.bf16.mxu0 %v243_v26  ;;  %v97_v9 = vld [vmem:[#allocation5 + $0x198] sm:$0xff]  ;;  %v273_v10 = vpack.c.bf16 %v92_v7, %v90_v6  ;;  %v94_v12 = vld [vmem:[#allocation5 + $0x180] sm:$0xff]  ;;  %v96_v13 = vld [vmem:[#allocation5 + $0x190] sm:$0xff] }
  0x39   :  { %v275_v11 = vpack.c.bf16 %v97_v9, %v95_v8  ;;  %v99_v14 = vld [vmem:[#allocation5 + $0x1a8] sm:$0xff]  ;;  %v101_v15 = vld [vmem:[#allocation5 + $0x1b8] sm:$0xff]  ;;  %v277_v16 = vpack.c.bf16 %v96_v13, %v94_v12  ;;  %v98_v18 = vld [vmem:[#allocation5 + $0x1a0] sm:$0xff] }
  0x3a   :  { %v279_v17 = vpack.c.bf16 %v101_v15, %v99_v14  ;;  %v100_v19 = vld [vmem:[#allocation5 + $0x1b0] sm:$0xff]  ;;  %v103_v20 = vld [vmem:[#allocation5 + $0x1c8] sm:$0xff]  ;;  %v105_v21 = vld [vmem:[#allocation5 + $0x1d8] sm:$0xff] }
  0x3b   :  { %246 = vmatpush1.bf16.msra.mxu0 %v245_v31  ;;  %v281_v22 = vpack.c.bf16 %v100_v19, %v98_v18  ;;  %v283_v23 = vpack.c.bf16 %v105_v21, %v103_v20  ;;  %v102_v24 = vld [vmem:[#allocation5 + $0x1c0] sm:$0xff]  ;;  %v104_v25 = vld [vmem:[#allocation5 + $0x1d0] sm:$0xff]  ;;  %v107_v26 = vld [vmem:[#allocation5 + $0x1e8] sm:$0xff] }
  0x3c   :  { %248 = vmatprep.subr.bf16.mxu0 %v247_v32  ;;  %v109_v27 = vld [vmem:[#allocation5 + $0x1f8] sm:$0xff]  ;;  %v285_v28 = vpack.c.bf16 %v104_v25, %v102_v24  ;;  %v106_v30 = vld [vmem:[#allocation5 + $0x1e0] sm:$0xff]  ;;  %v108_v31 = vld [vmem:[#allocation5 + $0x1f0] sm:$0xff] }
  0x3d   :  { %v287_v29 = vpack.c.bf16 %v109_v27, %v107_v26  ;;  %v289_v32 = vpack.c.bf16 %v108_v31, %v106_v30  ;;  %v44_v33 = vld [vmem:[#allocation2] sm:$0xff] }
  0x3f   :  { %250 = vmatpush1.bf16.msra.mxu0 %v249_v37  ;;  %v110_v37 = vld [vmem:[%s486_s2] sm:$0x3] }
  0x40   :  { %252 = vmatprep.subr.bf16.mxu0 %v251_v38  ;;  %v118_v38 = vsub.s32 1, %v113_v35  ;;  %v115_v39 = vrot.slane %v110_v37, %v114_v36 }
  0x42   :  { %v119_v40 = vrot.slane %v110_v37, %v118_v38 }
  0x43   :  { %254 = vmatpush1.bf16.msra.mxu0 %v253_v44 }
  0x44   :  { %256 = vmatprep.subr.bf16.mxu0 %v255_v45 }
  0x47   :  { %258 = vmatpush1.bf16.msra.mxu0 %v257_v50 }
  0x48   :  { %260 = vmatprep.subr.bf16.mxu0 %v259_v51 }
  0x4b   :  { %262 = vmatpush1.bf16.msra.mxu0 %v261_v56 }
  0x4c   :  { %264 = vmatprep.subr.bf16.mxu0 %v263_v57 }
  0x4f   :  { %266 = vmatpush1.bf16.msra.mxu0 %v265_v62 }
  0x50   :  { %268 = vmatprep.subr.bf16.mxu0 %v267_v63 }
  0x53   :  { %270 = vmatpush1.bf16.msra.mxu0 %v269_v4 }
  0x54   :  { %272 = vmatprep.subr.bf16.mxu0 %v271_v5 }
  0x57   :  { %274 = vmatpush1.bf16.msra.mxu0 %v273_v10 }
  0x58   :  { %276 = vmatprep.subr.bf16.mxu0 %v275_v11 }
  0x5b   :  { %278 = vmatpush1.bf16.msra.mxu0 %v277_v16 }
  0x5c   :  { %280 = vmatprep.subr.bf16.mxu0 %v279_v17 }
  0x5f   :  { %282 = vmatpush1.bf16.msra.mxu0 %v281_v22 }
  0x60   :  { %284 = vmatprep.subr.bf16.mxu0 %v283_v23 }
  0x63   :  { %286 = vmatpush1.bf16.msra.mxu0 %v285_v28 }
  0x64   :  { %288 = vmatprep.subr.bf16.mxu0 %v287_v29 }
  0x67   :  { %290 = vmatpush1.bf16.msra.mxu0 %v289_v32 }
  0x6a   :  { %187 = vmatmul.mubr.f32.vlgmr.msra.gmra.mrb[0].mxu0 %v44_v33 }
 0x13d   :  { %v188_v41 = vpop.f32.mrb[0].mxu0 }
 0x13e   :  { %v189_v42 = vadd.f32 %v188_v41, %v115_v39  ;;  %v190_v43 = vpop.f32.mrb[1].mxu0 }
 0x13f   :  { %v191_v44 = vadd.f32 %v190_v43, %v119_v40 }
 0x140   :  { %193 = vst [vmem:[#allocation7] sm:$0xff] %v189_v42 }
 0x141   :  { %v194_v45 = vmul.f32 1.442695, %v191_v44 }
 0x142   :  { %354 = shalt.err (!%p351_p6)
}
 0x143   :  { %s355_s19 = scalar_lea.hbm %s487_s3, 128 }
 0x144   :  { %p356_p7 = scmp.ne.s32.totalorder %s487_s3, %s355_s19  ;;  %p359_p8 = scmp.lt.u32.totalorder %s355_s19, %s487_s3 }
 0x146   :  { %p361_p9 = pnand %p359_p8, %p356_p7 }
 0x148   :  { %364 = shalt.err (!%p361_p9)
}
 0x149   :  { %206 = dma.vmem_to_hbm [thread:$0]  %s204_s16, 128, %s487_s3, [#allocation4]   ;;  %297 = vpow2.f32 %v194_v45 }
 0x14a   :  { %s400_s26 = smov [#allocation8]  }
 0x14b   :  { %s213_s27 = sshll.u32 %s400_s26, 4  ;;  %s214_s27 = int_to_ptr.vmem [resolvable:$true] %s213_s27 }
 0x14c   :  { %s365_s28 = scalar_lea.vmem %s214_s27, 128  ;;  %p370_p11 = scmp.lt.s32.totalorder %s214_s27, %s214_s27 }
 0x14d   :  { %p366_p10 = scmp.ne.s32.totalorder %s214_s27, %s365_s28  ;;  %p371_p12 = scmp.lt.s32.totalorder %s365_s28, %s365_s28 }
 0x14f   :  { %p372_p13 = por %p371_p12, %p370_p11 }
 0x151   :  { %p373_p0 = pnand %p372_p13, %p366_p10 }
 0x153   :  { %v298_v46 = vpop.eup %297 }
 0x154   :  { %196 = vst [vmem:[#allocation8] sm:$0xff] %v298_v46 }
 0x155   :  { %376 = shalt.err (!%p373_p0)
}
 0x156   :  { %s377_s5 = scalar_lea.hbm %s488_s4, 128 }
 0x157   :  { %p378_p1 = scmp.ne.s32.totalorder %s488_s4, %s377_s5  ;;  %p381_p2 = scmp.lt.u32.totalorder %s377_s5, %s488_s4 }
 0x159   :  { %p383_p3 = pnand %p381_p2, %p378_p1 }
 0x15b   :  { %386 = shalt.err (!%p383_p3)
}
 0x15c   :  { %216 = dma.vmem_to_hbm [thread:$0]  %s214_s27, 128, %s488_s4, [#allocation9]  }
 0x15d   :  { %391 = dma.done.wait [#allocation4], 128  }
 0x15e   :  { %392 = vsyncadd [#allocation4], 4294967168 }
 0x15f   :  { %393 = dma.done.wait [#allocation9], 128  }
 0x160   :  { %394 = vsyncadd [#allocation9], 4294967168 }
 0x161   :  { %223 = vsyncpa [#allocation3], 1 }
 0x162   :  { %224 = vsyncpa [#allocation6], 1 }
 0x163   :  { %225 = vsyncpa [#allocation4], 1 }
 0x164   :  { %226 = vsyncpa [#allocation9], 1 }

</bundles_post_ra>
